<compile_context>
chip_gen: v7x
topology: tpu7x:2x2x1
jax: 0.10.0
libtpu: 0.0.40
codegen_flags: <defaults>
</compile_context>

<pallas_src>
import functools

import jax
import jax.numpy as jnp
from jax.experimental import pallas as pl
from jax.experimental.pallas import tpu as pltpu

BN_EPS = 1e-5
CP = 128  # lane-padded channel width for the matmul path
# NOTE: the CP=128 lane pad of intermediates only amortizes at C >= 64; it is
# the right layout for real ResNet widths but wasteful at the toy widths used
# in the self-test below (acknowledged per review).


# ----------------------------- Pallas kernels -----------------------------

def _conv1_kernel(x_ref, w1_ref, *args, ho, wo, cin, downsample):
    """Stage 1: 3x3 conv (stride folded into polyphase planes) as ONE bf16
    matmul over a concatenated-K (m, 9*cin) LHS built in a VMEM scratch, plus
    (if downsampling) the 1x1/stride-2 shortcut conv, plus per-image BatchNorm
    partial sums (sum, sum of squares) kept in f32."""
    if downsample:
        ws_ref, z1_ref, zsc_ref, stats_ref, lhs_ref = args
    else:
        z1_ref, stats_ref, lhs_ref = args

    m = ho * wo
    for t in range(9):                       # static unroll over the 9 taps
        dh, dw = t // 3, t % 3
        if downsample:                       # stride 2: polyphase plane + offset
            p, oh, ow = (dh % 2) * 2 + (dw % 2), dh // 2, dw // 2
        else:                                # stride 1: single plane, offset=tap
            p, oh, ow = 0, dh, dw
        lhs_ref[:, t * cin:(t + 1) * cin] = (
            x_ref[0, p, oh:oh + ho, ow:ow + wo, :].reshape(m, cin))

    acc = jnp.dot(lhs_ref[...].astype(jnp.bfloat16), w1_ref[...],
                  preferred_element_type=jnp.float32)          # one MXU pass
    z1_ref[0] = acc.astype(jnp.bfloat16).reshape(ho, wo, CP)
    stats_ref[0, 0:1, :] = jnp.sum(acc, axis=0, keepdims=True)
    stats_ref[0, 1:2, :] = jnp.sum(acc * acc, axis=0, keepdims=True)

    if downsample:
        # plane (1,1) of the padded input == x[:, 2i, 2j, :] (1x1, stride 2, pad 0)
        xs = x_ref[0, 3, 0:ho, 0:wo, :].reshape(m, cin).astype(jnp.bfloat16)
        zsc = jnp.dot(xs, ws_ref[...], preferred_element_type=jnp.float32)
        zsc_ref[0] = zsc.astype(jnp.bfloat16).reshape(ho, wo, CP)
        stats_ref[0, 2:3, :] = jnp.sum(zsc, axis=0, keepdims=True)
        stats_ref[0, 3:4, :] = jnp.sum(zsc * zsc, axis=0, keepdims=True)


def _conv2_kernel(z1_ref, w2_ref, bnp_ref, z2_ref, stats_ref, y1pad_ref, *, ho, wo):
    """Stage 2: BN1 (global stats) + ReLU fused with the second 3x3 conv as a
    single (m, 9*128) x (9*128, 128) bf16 matmul, plus per-image BN partial
    sums for layer 2. The zero-padded activation lives only in VMEM scratch."""
    m = ho * wo
    mean1 = bnp_ref[0:1, :]
    inv1 = bnp_ref[1:2, :]
    z1 = z1_ref[0].reshape(m, CP).astype(jnp.float32)
    y1 = jnp.maximum((z1 - mean1) * inv1, 0.0)

    # Re-zero only the 1-pixel halo each step; interior is overwritten below.
    zrow = jnp.zeros((1, wo + 2, CP), jnp.float32)
    zcol = jnp.zeros((ho, 1, CP), jnp.float32)
    y1pad_ref[0:1, :, :] = zrow
    y1pad_ref[ho + 1:ho + 2, :, :] = zrow
    y1pad_ref[1:1 + ho, 0:1, :] = zcol
    y1pad_ref[1:1 + ho, wo + 1:wo + 2, :] = zcol
    y1pad_ref[1:1 + ho, 1:1 + wo, :] = y1.reshape(ho, wo, CP)

    taps = [y1pad_ref[dh:dh + ho, dw:dw + wo, :].reshape(m, CP).astype(jnp.bfloat16)
            for dh in range(3) for dw in range(3)]
    lhs = jnp.concatenate(taps, axis=-1)                        # (m, 9*128) bf16, lane-aligned
    acc = jnp.dot(lhs, w2_ref[...], preferred_element_type=jnp.float32)

    z2_ref[0] = acc.astype(jnp.bfloat16).reshape(ho, wo, CP)
    stats_ref[0, 0:1, :] = jnp.sum(acc, axis=0, keepdims=True)
    stats_ref[0, 1:2, :] = jnp.sum(acc * acc, axis=0, keepdims=True)


def _finalize_kernel(z2_ref, sc_ref, bnp_ref, out_ref, *, ho, wo, cout, downsample):
    """Stage 3 (fused epilogue): BN2 + ReLU + shortcut (BN for the conv
    shortcut, identity otherwise) + residual add + final ReLU.  Output is
    written at its true channel width."""
    m = ho * wo
    mean2 = bnp_ref[0:1, :]
    inv2 = bnp_ref[1:2, :]
    z2 = z2_ref[0].reshape(m, CP).astype(jnp.float32)
    y2 = jnp.maximum((z2 - mean2) * inv2, 0.0)
    if downsample:
        zsc = sc_ref[0].reshape(m, CP).astype(jnp.float32)
        sc = (zsc - bnp_ref[2:3, :]) * bnp_ref[3:4, :]
        out = jnp.maximum(y2 + sc, 0.0)[:, 0:cout]
    else:
        sc = sc_ref[0].reshape(m, cout)              # identity shortcut, true width
        out = jnp.maximum(y2[:, 0:cout] + sc, 0.0)
    out_ref[0] = out.reshape(ho, wo, cout)


# ------------------------------- wrapper ------------------------------------

def _bn_from_sums(s, q, count):
    mean = s / count
    var = jnp.maximum(q / count - mean * mean, 0.0)   # clamp tiny negative rounding
    return mean, jax.lax.rsqrt(var + BN_EPS)


def basic_block_forward(x_nchw, w1, w2, ws, in_features, out_features):
    """Pallas implementation of BasicBlock.forward.

    x_nchw: (N, Cin, H, W) f32
    w1: (3,3,Cin,Cout) HWIO conv1 (stride s);  w2: (3,3,Cout,Cout) conv2
    ws: (1,1,Cin,Cout) shortcut 1x1 conv (only used when downsampling)
    """
    if in_features == out_features:
        downsample = False
    elif in_features * 2 == out_features:
        downsample = True
    else:
        raise ValueError("in_features must equal out_features or out_features/2")
    stride = 2 if downsample else 1

    x = jnp.transpose(x_nchw, (0, 2, 3, 1)).astype(jnp.float32)   # NHWC
    n, h, w, cin = x.shape
    cout = out_features
    if downsample and (h % 2 or w % 2):
        raise ValueError("downsample blocks require even spatial dims")
    ho, wo = h // stride, w // stride
    m = ho * wo
    m_total = n * m

    # Spatially pad once; for stride 2 split into a 2x2 polyphase stack so the
    # kernels only ever do contiguous (stride-1) window reads (no HBM im2col).
    # TODO(synk): fold the pad / polyphase split into the kernel (strided ref
    # reads + masked border taps) to save two wrapper passes over x.
    xp = jnp.pad(x, ((0, 0), (1, 1), (1, 1), (0, 0)))
    if downsample:
        x_ph = jnp.stack([xp[:, a::2, b::2, :] for a in (0, 1) for b in (0, 1)],
                         axis=1)                                  # (N,4,H/2+1,W/2+1,Cin)
    else:
        x_ph = xp[:, None]                                        # (N,1,H+2,W+2,Cin)
    nph, hp, wp = x_ph.shape[1], x_ph.shape[2], x_ph.shape[3]

    # Concatenated-K bf16 weights (N lane-padded to 128).
    wk1 = jnp.pad(w1.reshape(9 * cin, cout),
                  ((0, 0), (0, CP - cout))).astype(jnp.bfloat16)          # (9*cin, 128)
    wk2 = jnp.pad(w2.reshape(9, cout, cout),
                  ((0, 0), (0, CP - cout), (0, CP - cout))
                  ).reshape(9 * CP, CP).astype(jnp.bfloat16)              # (9*128, 128)
    wks = jnp.pad(ws.reshape(cin, cout),
                  ((0, 0), (0, CP - cout))).astype(jnp.bfloat16)          # (cin, 128)

    cparams = pltpu.CompilerParams(dimension_semantics=("parallel",),
                                   vmem_limit_bytes=32 * 1024 * 1024)
    # TODO(synk): add a spatial (row-strip) grid axis so v7x megacore gets >1
    # step per core and whole-image blocks stay within 64 MiB VMEM at real
    # ResNet spatial sizes.

    x_spec = pl.BlockSpec((1, nph, hp, wp, cin), lambda i: (i, 0, 0, 0, 0))
    w1_spec = pl.BlockSpec((9 * cin, CP), lambda i: (0, 0))
    ws_spec = pl.BlockSpec((cin, CP), lambda i: (0, 0))
    w2_spec = pl.BlockSpec((9 * CP, CP), lambda i: (0, 0))
    bnp_spec = pl.BlockSpec((8, CP), lambda i: (0, 0))
    map_spec = pl.BlockSpec((1, ho, wo, CP), lambda i: (i, 0, 0, 0))
    stats_spec = pl.BlockSpec((1, 8, CP), lambda i: (i, 0, 0))
    map_shape = jax.ShapeDtypeStruct((n, ho, wo, CP), jnp.bfloat16)       # bf16 inter-stage maps
    stats_shape = jax.ShapeDtypeStruct((n, 8, CP), jnp.float32)

    map_bytes = n * m * CP * 2
    stats_bytes = n * 8 * CP * 4

    # ---- stage 1: conv1 (+ shortcut conv) + BN partial sums -----------------
    flops1 = 2 * m_total * (9 * cin) * CP + (2 * m_total * cin * CP if downsample else 0)
    bytes1 = (int(x_ph.size) * 4 + int(wk1.size) * 2
              + (int(wks.size) * 2 if downsample else 0)
              + map_bytes * (2 if downsample else 1) + stats_bytes)
    cost1 = pl.CostEstimate(flops=int(flops1), transcendentals=0,
                            bytes_accessed=int(bytes1))
    if downsample:
        z1, zsc, st1 = pl.pallas_call(
            functools.partial(_conv1_kernel, ho=ho, wo=wo, cin=cin, downsample=True),
            grid=(n,),
            in_specs=[x_spec, w1_spec, ws_spec],
            out_specs=(map_spec, map_spec, stats_spec),
            out_shape=(map_shape, map_shape, stats_shape),
            scratch_shapes=[pltpu.VMEM((m, 9 * cin), jnp.float32)],
            compiler_params=cparams,
            cost_estimate=cost1,
        )(x_ph, wk1, wks)
    else:
        z1, st1 = pl.pallas_call(
            functools.partial(_conv1_kernel, ho=ho, wo=wo, cin=cin, downsample=False),
            grid=(n,),
            in_specs=[x_spec, w1_spec],
            out_specs=(map_spec, stats_spec),
            out_shape=(map_shape, stats_shape),
            scratch_shapes=[pltpu.VMEM((m, 9 * cin), jnp.float32)],
            compiler_params=cparams,
            cost_estimate=cost1,
        )(x_ph, wk1)
        zsc = None

    tot1 = jnp.sum(st1, axis=0)                   # tiny (8, 128) reduction
    mean1, inv1 = _bn_from_sums(tot1[0], tot1[1], m_total)
    zrow = jnp.zeros((CP,), jnp.float32)
    bnp1 = jnp.stack([mean1, inv1] + [zrow] * 6, axis=0)

    # ---- stage 2: BN1 + ReLU + conv2 + BN partial sums ----------------------
    flops2 = 2 * m_total * (9 * CP) * CP
    bytes2 = 2 * map_bytes + int(wk2.size) * 2 + 8 * CP * 4 + stats_bytes
    cost2 = pl.CostEstimate(flops=int(flops2), transcendentals=0,
                            bytes_accessed=int(bytes2))
    z2, st2 = pl.pallas_call(
        functools.partial(_conv2_kernel, ho=ho, wo=wo),
        grid=(n,),
        in_specs=[map_spec, w2_spec, bnp_spec],
        out_specs=(map_spec, stats_spec),
        out_shape=(map_shape, stats_shape),
        scratch_shapes=[pltpu.VMEM((ho + 2, wo + 2, CP), jnp.float32)],
        compiler_params=cparams,
        cost_estimate=cost2,
    )(z1, wk2, bnp1)

    tot2 = jnp.sum(st2, axis=0)
    mean2, inv2 = _bn_from_sums(tot2[0], tot2[1], m_total)
    if downsample:
        mean_s, inv_s = _bn_from_sums(tot1[2], tot1[3], m_total)
        bnp2 = jnp.stack([mean2, inv2, mean_s, inv_s] + [zrow] * 4, axis=0)
        sc_arr, sc_spec, sc_bytes = zsc, map_spec, map_bytes
    else:
        bnp2 = jnp.stack([mean2, inv2] + [zrow] * 6, axis=0)
        sc_arr = x                                               # raw NHWC input, true width
        sc_spec = pl.BlockSpec((1, h, w, cin), lambda i: (i, 0, 0, 0))
        sc_bytes = int(x.size) * 4

    # ---- stage 3: fused BN2 + ReLU + shortcut(+BN) + add + ReLU -------------
    out_shape = jax.ShapeDtypeStruct((n, ho, wo, cout), jnp.float32)
    out_spec = pl.BlockSpec((1, ho, wo, cout), lambda i: (i, 0, 0, 0))
    bytes3 = map_bytes + sc_bytes + n * m * cout * 4 + 8 * CP * 4
    cost3 = pl.CostEstimate(flops=int(8 * m_total * CP), transcendentals=0,
                            bytes_accessed=int(bytes3))
    out_nhwc = pl.pallas_call(
        functools.partial(_finalize_kernel, ho=ho, wo=wo, cout=cout,
                          downsample=downsample),
        grid=(n,),
        in_specs=[map_spec, sc_spec, bnp_spec],
        out_specs=out_spec,
        out_shape=out_shape,
        compiler_params=cparams,
        cost_estimate=cost3,
    )(z2, sc_arr, bnp2)

    # TODO(synk): the final NHWC->NCHW permutation stays in the wrapper (the
    # public interface is NCHW; it is a within-block permutation).
    return jnp.transpose(out_nhwc, (0, 3, 1, 2))


# --------------------------- pure-JAX reference -----------------------------

def _ref_forward(x_nchw, w1, w2, ws, in_features, out_features):
    downsample = in_features != out_features
    stride = 2 if downsample else 1
    x = jnp.transpose(x_nchw, (0, 2, 3, 1)).astype(jnp.float32)

    def conv(v, wgt, s, pad):
        return jax.lax.conv_general_dilated(
            v, wgt, window_strides=(s, s), padding=[(pad, pad), (pad, pad)],
            dimension_numbers=("NHWC", "HWIO", "NHWC"),
            precision=jax.lax.Precision.HIGHEST)

    def bn(z):
        mean = jnp.mean(z, axis=(0, 1, 2), keepdims=True)
        var = jnp.mean((z - mean) ** 2, axis=(0, 1, 2), keepdims=True)
        return (z - mean) * jax.lax.rsqrt(var + BN_EPS)

    y = jax.nn.relu(bn(conv(x, w1, stride, 1)))
    y = jax.nn.relu(bn(conv(y, w2, 1, 1)))
    sc = bn(conv(x, ws, 2, 0)) if downsample else x
    out = jax.nn.relu(y + sc)
    return jnp.transpose(out, (0, 3, 1, 2))


# --------------------------------- main --------------------------------------

def _make_params(key, cin, cout):
    k1, k2, k3 = jax.random.split(key, 3)
    w1 = 0.1 * jax.random.normal(k1, (3, 3, cin, cout), jnp.float32)
    w2 = 0.1 * jax.random.normal(k2, (3, 3, cout, cout), jnp.float32)
    ws = 0.1 * jax.random.normal(k3, (1, 1, cin, cout), jnp.float32)
    return w1, w2, ws


if __name__ == "__main__":
    key = jax.random.PRNGKey(0)
    kx, kp1, kp2 = jax.random.split(key, 3)

    x = jax.random.normal(kx, (2, 4, 16, 16), jnp.float32)

    # Tolerance 4e-2: matmuls use bf16 MXU inputs with f32 accumulation and
    # inter-stage maps are stored in bf16 (per perf guidance); the reference
    # uses f32 HIGHEST-precision convolutions.

    # Case 1: downsample block (in=4 -> out=8), output NCHW (2, 8, 8, 8)
    w1, w2, ws = _make_params(kp1, 4, 8)
    out_ds = jax.block_until_ready(
        basic_block_forward(x, w1, w2, ws, in_features=4, out_features=8))
    ref_ds = _ref_forward(x, w1, w2, ws, 4, 8)
    assert out_ds.shape == (2, 8, 8, 8)
    assert jnp.allclose(out_ds, ref_ds, rtol=4e-2, atol=4e-2), \
        float(jnp.max(jnp.abs(out_ds - ref_ds)))

    # Case 2: identity block (in=4 -> out=4), output NCHW (2, 4, 16, 16)
    w1b, w2b, wsb = _make_params(kp2, 4, 4)
    out_id = jax.block_until_ready(
        basic_block_forward(x, w1b, w2b, wsb, in_features=4, out_features=4))
    ref_id = _ref_forward(x, w1b, w2b, wsb, 4, 4)
    assert out_id.shape == (2, 4, 16, 16)
    assert jnp.allclose(out_id, ref_id, rtol=4e-2, atol=4e-2), \
        float(jnp.max(jnp.abs(out_id - ref_id)))

    print("KERNEL_OK")
</pallas_src>

<mosaic_0001>
module attributes {stable_mosaic.version = 11 : i64} {
  func.func @_conv1_kernel(%arg0: i32, %arg1: memref<1x4x9x9x4xf32, #tpu.memory_space<vmem>>, %arg2: memref<36x128xbf16, #tpu.memory_space<vmem>>, %arg3: memref<4x128xbf16, #tpu.memory_space<vmem>>, %arg4: memref<1x8x8x128xbf16, #tpu.memory_space<vmem>>, %arg5: memref<1x8x8x128xbf16, #tpu.memory_space<vmem>>, %arg6: memref<1x8x128xf32, #tpu.memory_space<vmem>>, %arg7: memref<64x36xf32, #tpu.memory_space<vmem>>) attributes {dimension_semantics = [#tpu.dimension_semantics<parallel>], iteration_bounds = array<i64: 2>, scalar_prefetch = 0 : i64, scratch_operands = 1 : i64, tpu.core_type = #tpu.core_type<tc>, window_params = [{transform_indices = @transform_0, window_bounds = array<i64: 1, 4, 9, 9, 4>}, {pipeline_mode = #tpu.pipeline_mode<synchronous>, transform_indices = @transform_1, window_bounds = array<i64: 36, 128>}, {pipeline_mode = #tpu.pipeline_mode<synchronous>, transform_indices = @transform_2, window_bounds = array<i64: 4, 128>}, {transform_indices = @transform_3, window_bounds = array<i64: 1, 8, 8, 128>}, {transform_indices = @transform_4, window_bounds = array<i64: 1, 8, 8, 128>}, {transform_indices = @transform_5, window_bounds = array<i64: 1, 8, 128>}]} {
    %c0 = arith.constant 0 : index
    %c0_0 = arith.constant 0 : index
    %c0_1 = arith.constant 0 : index
    %c0_2 = arith.constant 0 : index
    %c0_3 = arith.constant 0 : index
    %0 = vector.load %arg1[%c0, %c0_0, %c0_1, %c0_2, %c0_3] : memref<1x4x9x9x4xf32, #tpu.memory_space<vmem>>, vector<1x1x8x8x4xf32>
    %1 = vector.shape_cast %0 : vector<1x1x8x8x4xf32> to vector<8x8x4xf32>
    %2 = vector.shape_cast %1 : vector<8x8x4xf32> to vector<64x4xf32>
    %c0_4 = arith.constant 0 : index
    %c0_5 = arith.constant 0 : index
    %3 = vector.load %arg7[%c0_4, %c0_5] : memref<64x36xf32, #tpu.memory_space<vmem>>, vector<64x4xf32>
    tpu.vector_store %arg7[%c0_4, %c0_5], %2 {strides = array<i32>} : memref<64x36xf32, #tpu.memory_space<vmem>>, vector<64x4xf32>,
    %c0_6 = arith.constant 0 : index
    %c1 = arith.constant 1 : index
    %c0_7 = arith.constant 0 : index
    %c0_8 = arith.constant 0 : index
    %c0_9 = arith.constant 0 : index
    %4 = vector.load %arg1[%c0_6, %c1, %c0_7, %c0_8, %c0_9] : memref<1x4x9x9x4xf32, #tpu.memory_space<vmem>>, vector<1x1x8x8x4xf32>
    %5 = vector.shape_cast %4 : vector<1x1x8x8x4xf32> to vector<8x8x4xf32>
    %6 = vector.shape_cast %5 : vector<8x8x4xf32> to vector<64x4xf32>
    %c0_10 = arith.constant 0 : index
    %c4 = arith.constant 4 : index
    %7 = vector.load %arg7[%c0_10, %c4] : memref<64x36xf32, #tpu.memory_space<vmem>>, vector<64x4xf32>
    tpu.vector_store %arg7[%c0_10, %c4], %6 {strides = array<i32>} : memref<64x36xf32, #tpu.memory_space<vmem>>, vector<64x4xf32>,
    %c0_11 = arith.constant 0 : index
    %c0_12 = arith.constant 0 : index
    %c0_13 = arith.constant 0 : index
    %c1_14 = arith.constant 1 : index
    %c0_15 = arith.constant 0 : index
    %8 = vector.load %arg1[%c0_11, %c0_12, %c0_13, %c1_14, %c0_15] : memref<1x4x9x9x4xf32, #tpu.memory_space<vmem>>, vector<1x1x8x8x4xf32>
    %9 = vector.shape_cast %8 : vector<1x1x8x8x4xf32> to vector<8x8x4xf32>
    %10 = vector.shape_cast %9 : vector<8x8x4xf32> to vector<64x4xf32>
    %c0_16 = arith.constant 0 : index
    %c8 = arith.constant 8 : index
    %11 = vector.load %arg7[%c0_16, %c8] : memref<64x36xf32, #tpu.memory_space<vmem>>, vector<64x4xf32>
    tpu.vector_store %arg7[%c0_16, %c8], %10 {strides = array<i32>} : memref<64x36xf32, #tpu.memory_space<vmem>>, vector<64x4xf32>,
    %c0_17 = arith.constant 0 : index
    %c2 = arith.constant 2 : index
    %c0_18 = arith.constant 0 : index
    %c0_19 = arith.constant 0 : index
    %c0_20 = arith.constant 0 : index
    %12 = vector.load %arg1[%c0_17, %c2, %c0_18, %c0_19, %c0_20] : memref<1x4x9x9x4xf32, #tpu.memory_space<vmem>>, vector<1x1x8x8x4xf32>
    %13 = vector.shape_cast %12 : vector<1x1x8x8x4xf32> to vector<8x8x4xf32>
    %14 = vector.shape_cast %13 : vector<8x8x4xf32> to vector<64x4xf32>
    %c0_21 = arith.constant 0 : index
    %c12 = arith.constant 12 : index
    %15 = vector.load %arg7[%c0_21, %c12] : memref<64x36xf32, #tpu.memory_space<vmem>>, vector<64x4xf32>
    tpu.vector_store %arg7[%c0_21, %c12], %14 {strides = array<i32>} : memref<64x36xf32, #tpu.memory_space<vmem>>, vector<64x4xf32>,
    %c0_22 = arith.constant 0 : index
    %c3 = arith.constant 3 : index
    %c0_23 = arith.constant 0 : index
    %c0_24 = arith.constant 0 : index
    %c0_25 = arith.constant 0 : index
    %16 = vector.load %arg1[%c0_22, %c3, %c0_23, %c0_24, %c0_25] : memref<1x4x9x9x4xf32, #tpu.memory_space<vmem>>, vector<1x1x8x8x4xf32>
    %17 = vector.shape_cast %16 : vector<1x1x8x8x4xf32> to vector<8x8x4xf32>
    %18 = vector.shape_cast %17 : vector<8x8x4xf32> to vector<64x4xf32>
    %c0_26 = arith.constant 0 : index
    %c16 = arith.constant 16 : index
    %19 = vector.load %arg7[%c0_26, %c16] : memref<64x36xf32, #tpu.memory_space<vmem>>, vector<64x4xf32>
    tpu.vector_store %arg7[%c0_26, %c16], %18 {strides = array<i32>} : memref<64x36xf32, #tpu.memory_space<vmem>>, vector<64x4xf32>,
    %c0_27 = arith.constant 0 : index
    %c2_28 = arith.constant 2 : index
    %c0_29 = arith.constant 0 : index
    %c1_30 = arith.constant 1 : index
    %c0_31 = arith.constant 0 : index
    %20 = vector.load %arg1[%c0_27, %c2_28, %c0_29, %c1_30, %c0_31] : memref<1x4x9x9x4xf32, #tpu.memory_space<vmem>>, vector<1x1x8x8x4xf32>
    %21 = vector.shape_cast %20 : vector<1x1x8x8x4xf32> to vector<8x8x4xf32>
    %22 = vector.shape_cast %21 : vector<8x8x4xf32> to vector<64x4xf32>
    %c0_32 = arith.constant 0 : index
    %c20 = arith.constant 20 : index
    %23 = vector.load %arg7[%c0_32, %c20] : memref<64x36xf32, #tpu.memory_space<vmem>>, vector<64x4xf32>
    tpu.vector_store %arg7[%c0_32, %c20], %22 {strides = array<i32>} : memref<64x36xf32, #tpu.memory_space<vmem>>, vector<64x4xf32>,
    %c0_33 = arith.constant 0 : index
    %c0_34 = arith.constant 0 : index
    %c1_35 = arith.constant 1 : index
    %c0_36 = arith.constant 0 : index
    %c0_37 = arith.constant 0 : index
    %24 = vector.load %arg1[%c0_33, %c0_34, %c1_35, %c0_36, %c0_37] : memref<1x4x9x9x4xf32, #tpu.memory_space<vmem>>, vector<1x1x8x8x4xf32>
    %25 = vector.shape_cast %24 : vector<1x1x8x8x4xf32> to vector<8x8x4xf32>
    %26 = vector.shape_cast %25 : vector<8x8x4xf32> to vector<64x4xf32>
    %c0_38 = arith.constant 0 : index
    %c24 = arith.constant 24 : index
    %27 = vector.load %arg7[%c0_38, %c24] : memref<64x36xf32, #tpu.memory_space<vmem>>, vector<64x4xf32>
    tpu.vector_store %arg7[%c0_38, %c24], %26 {strides = array<i32>} : memref<64x36xf32, #tpu.memory_space<vmem>>, vector<64x4xf32>,
    %c0_39 = arith.constant 0 : index
    %c1_40 = arith.constant 1 : index
    %c1_41 = arith.constant 1 : index
    %c0_42 = arith.constant 0 : index
    %c0_43 = arith.constant 0 : index
    %28 = vector.load %arg1[%c0_39, %c1_40, %c1_41, %c0_42, %c0_43] : memref<1x4x9x9x4xf32, #tpu.memory_space<vmem>>, vector<1x1x8x8x4xf32>
    %29 = vector.shape_cast %28 : vector<1x1x8x8x4xf32> to vector<8x8x4xf32>
    %30 = vector.shape_cast %29 : vector<8x8x4xf32> to vector<64x4xf32>
    %c0_44 = arith.constant 0 : index
    %c28 = arith.constant 28 : index
    %31 = vector.load %arg7[%c0_44, %c28] : memref<64x36xf32, #tpu.memory_space<vmem>>, vector<64x4xf32>
    tpu.vector_store %arg7[%c0_44, %c28], %30 {strides = array<i32>} : memref<64x36xf32, #tpu.memory_space<vmem>>, vector<64x4xf32>,
    %c0_45 = arith.constant 0 : index
    %c0_46 = arith.constant 0 : index
    %c1_47 = arith.constant 1 : index
    %c1_48 = arith.constant 1 : index
    %c0_49 = arith.constant 0 : index
    %32 = vector.load %arg1[%c0_45, %c0_46, %c1_47, %c1_48, %c0_49] : memref<1x4x9x9x4xf32, #tpu.memory_space<vmem>>, vector<1x1x8x8x4xf32>
    %33 = vector.shape_cast %32 : vector<1x1x8x8x4xf32> to vector<8x8x4xf32>
    %34 = vector.shape_cast %33 : vector<8x8x4xf32> to vector<64x4xf32>
    %c0_50 = arith.constant 0 : index
    %c32 = arith.constant 32 : index
    %35 = vector.load %arg7[%c0_50, %c32] : memref<64x36xf32, #tpu.memory_space<vmem>>, vector<64x4xf32>
    tpu.vector_store %arg7[%c0_50, %c32], %34 {strides = array<i32>} : memref<64x36xf32, #tpu.memory_space<vmem>>, vector<64x4xf32>,
    %c0_51 = arith.constant 0 : index
    %c0_52 = arith.constant 0 : index
    %36 = vector.load %arg7[%c0_51, %c0_52] : memref<64x36xf32, #tpu.memory_space<vmem>>, vector<64x36xf32>
    %37 = arith.truncf %36 : vector<64x36xf32> to vector<64x36xbf16>
    %c0_53 = arith.constant 0 : index
    %c0_54 = arith.constant 0 : index
    %38 = vector.load %arg2[%c0_53, %c0_54] : memref<36x128xbf16, #tpu.memory_space<vmem>>, vector<36x128xbf16>
    %cst = arith.constant dense<0.000000e+00> : vector<64x128xf32>
    %39 = tpu.matmul %37, %38, %cst {dimension_numbers = #tpu.dot_dimension_numbers<[1], [0], [0], [1], [0, 0, 1, 1], [], []>} : vector<64x36xbf16>, vector<36x128xbf16>, vector<64x128xf32> -> vector<64x128xf32>
    %40 = arith.truncf %39 : vector<64x128xf32> to vector<64x128xbf16>
    %41 = vector.shape_cast %40 : vector<64x128xbf16> to vector<8x8x128xbf16>
    %c0_55 = arith.constant 0 : index
    %c0_56 = arith.constant 0 : index
    %c0_57 = arith.constant 0 : index
    %c0_58 = arith.constant 0 : index
    %42 = vector.load %arg4[%c0_55, %c0_56, %c0_57, %c0_58] : memref<1x8x8x128xbf16, #tpu.memory_space<vmem>>, vector<1x8x8x128xbf16>
    %43 = vector.shape_cast %42 : vector<1x8x8x128xbf16> to vector<8x8x128xbf16>
    %44 = vector.shape_cast %41 : vector<8x8x128xbf16> to vector<1x8x8x128xbf16>
    tpu.vector_store %arg4[%c0_55, %c0_56, %c0_57, %c0_58], %44 {strides = array<i32>} : memref<1x8x8x128xbf16, #tpu.memory_space<vmem>>, vector<1x8x8x128xbf16>,
    %cst_59 = arith.constant dense<0.000000e+00> : vector<128xf32>
    %45 = vector.multi_reduction <add>, %39, %cst_59 [0] : vector<64x128xf32> to vector<128xf32>
    %46 = vector.shape_cast %45 : vector<128xf32> to vector<1x128xf32>
    %c0_60 = arith.constant 0 : index
    %c0_61 = arith.constant 0 : index
    %c0_62 = arith.constant 0 : index
    %47 = vector.load %arg6[%c0_60, %c0_61, %c0_62] : memref<1x8x128xf32, #tpu.memory_space<vmem>>, vector<1x1x128xf32>
    %48 = vector.shape_cast %47 : vector<1x1x128xf32> to vector<1x128xf32>
    %49 = vector.shape_cast %46 : vector<1x128xf32> to vector<1x1x128xf32>
    tpu.vector_store %arg6[%c0_60, %c0_61, %c0_62], %49 {strides = array<i32>} : memref<1x8x128xf32, #tpu.memory_space<vmem>>, vector<1x1x128xf32>,
    %50 = arith.mulf %39, %39 : vector<64x128xf32>
    %cst_63 = arith.constant dense<0.000000e+00> : vector<128xf32>
    %51 = vector.multi_reduction <add>, %50, %cst_63 [0] : vector<64x128xf32> to vector<128xf32>
    %52 = vector.shape_cast %51 : vector<128xf32> to vector<1x128xf32>
    %c0_64 = arith.constant 0 : index
    %c1_65 = arith.constant 1 : index
    %c0_66 = arith.constant 0 : index
    %53 = vector.load %arg6[%c0_64, %c1_65, %c0_66] : memref<1x8x128xf32, #tpu.memory_space<vmem>>, vector<1x1x128xf32>
    %54 = vector.shape_cast %53 : vector<1x1x128xf32> to vector<1x128xf32>
    %55 = vector.shape_cast %52 : vector<1x128xf32> to vector<1x1x128xf32>
    tpu.vector_store %arg6[%c0_64, %c1_65, %c0_66], %55 {strides = array<i32>} : memref<1x8x128xf32, #tpu.memory_space<vmem>>, vector<1x1x128xf32>,
    %c0_67 = arith.constant 0 : index
    %c3_68 = arith.constant 3 : index
    %c0_69 = arith.constant 0 : index
    %c0_70 = arith.constant 0 : index
    %c0_71 = arith.constant 0 : index
    %56 = vector.load %arg1[%c0_67, %c3_68, %c0_69, %c0_70, %c0_71] : memref<1x4x9x9x4xf32, #tpu.memory_space<vmem>>, vector<1x1x8x8x4xf32>
    %57 = vector.shape_cast %56 : vector<1x1x8x8x4xf32> to vector<8x8x4xf32>
    %58 = vector.shape_cast %57 : vector<8x8x4xf32> to vector<64x4xf32>
    %59 = arith.truncf %58 : vector<64x4xf32> to vector<64x4xbf16>
    %c0_72 = arith.constant 0 : index
    %c0_73 = arith.constant 0 : index
    %60 = vector.load %arg3[%c0_72, %c0_73] : memref<4x128xbf16, #tpu.memory_space<vmem>>, vector<4x128xbf16>
    %cst_74 = arith.constant dense<0.000000e+00> : vector<64x128xf32>
    %61 = tpu.matmul %59, %60, %cst_74 {dimension_numbers = #tpu.dot_dimension_numbers<[1], [0], [0], [1], [0, 0, 1, 1], [], []>} : vector<64x4xbf16>, vector<4x128xbf16>, vector<64x128xf32> -> vector<64x128xf32>
    %62 = arith.truncf %61 : vector<64x128xf32> to vector<64x128xbf16>
    %63 = vector.shape_cast %62 : vector<64x128xbf16> to vector<8x8x128xbf16>
    %c0_75 = arith.constant 0 : index
    %c0_76 = arith.constant 0 : index
    %c0_77 = arith.constant 0 : index
    %c0_78 = arith.constant 0 : index
    %64 = vector.load %arg5[%c0_75, %c0_76, %c0_77, %c0_78] : memref<1x8x8x128xbf16, #tpu.memory_space<vmem>>, vector<1x8x8x128xbf16>
    %65 = vector.shape_cast %64 : vector<1x8x8x128xbf16> to vector<8x8x128xbf16>
    %66 = vector.shape_cast %63 : vector<8x8x128xbf16> to vector<1x8x8x128xbf16>
    tpu.vector_store %arg5[%c0_75, %c0_76, %c0_77, %c0_78], %66 {strides = array<i32>} : memref<1x8x8x128xbf16, #tpu.memory_space<vmem>>, vector<1x8x8x128xbf16>,
    %cst_79 = arith.constant dense<0.000000e+00> : vector<128xf32>
    %67 = vector.multi_reduction <add>, %61, %cst_79 [0] : vector<64x128xf32> to vector<128xf32>
    %68 = vector.shape_cast %67 : vector<128xf32> to vector<1x128xf32>
    %c0_80 = arith.constant 0 : index
    %c2_81 = arith.constant 2 : index
    %c0_82 = arith.constant 0 : index
    %69 = vector.load %arg6[%c0_80, %c2_81, %c0_82] : memref<1x8x128xf32, #tpu.memory_space<vmem>>, vector<1x1x128xf32>
    %70 = vector.shape_cast %69 : vector<1x1x128xf32> to vector<1x128xf32>
    %71 = vector.shape_cast %68 : vector<1x128xf32> to vector<1x1x128xf32>
    tpu.vector_store %arg6[%c0_80, %c2_81, %c0_82], %71 {strides = array<i32>} : memref<1x8x128xf32, #tpu.memory_space<vmem>>, vector<1x1x128xf32>,
    %72 = arith.mulf %61, %61 : vector<64x128xf32>
    %cst_83 = arith.constant dense<0.000000e+00> : vector<128xf32>
    %73 = vector.multi_reduction <add>, %72, %cst_83 [0] : vector<64x128xf32> to vector<128xf32>
    %74 = vector.shape_cast %73 : vector<128xf32> to vector<1x128xf32>
    %c0_84 = arith.constant 0 : index
    %c3_85 = arith.constant 3 : index
    %c0_86 = arith.constant 0 : index
    %75 = vector.load %arg6[%c0_84, %c3_85, %c0_86] : memref<1x8x128xf32, #tpu.memory_space<vmem>>, vector<1x1x128xf32>
    %76 = vector.shape_cast %75 : vector<1x1x128xf32> to vector<1x128xf32>
    %77 = vector.shape_cast %74 : vector<1x128xf32> to vector<1x1x128xf32>
    tpu.vector_store %arg6[%c0_84, %c3_85, %c0_86], %77 {strides = array<i32>} : memref<1x8x128xf32, #tpu.memory_space<vmem>>, vector<1x1x128xf32>,
    return
  }
  func.func @transform_0(%arg0: i32) -> (i32, i32, i32, i32, i32) {
    %c0_i32 = arith.constant 0 : i32
    %c0_i32_0 = arith.constant 0 : i32
    %c0_i32_1 = arith.constant 0 : i32
    %c0_i32_2 = arith.constant 0 : i32
    %c0_i32_3 = arith.constant 0 : i32
    return %arg0, %c0_i32, %c0_i32_0, %c0_i32_1, %c0_i32_2 : i32, i32, i32, i32, i32
  }
  func.func @transform_1(%arg0: i32) -> (i32, i32) {
    %c0_i32 = arith.constant 0 : i32
    %c0_i32_0 = arith.constant 0 : i32
    %c0_i32_1 = arith.constant 0 : i32
    return %c0_i32, %c0_i32_0 : i32, i32
  }
  func.func @transform_2(%arg0: i32) -> (i32, i32) {
    %c0_i32 = arith.constant 0 : i32
    %c0_i32_0 = arith.constant 0 : i32
    %c0_i32_1 = arith.constant 0 : i32
    return %c0_i32, %c0_i32_0 : i32, i32
  }
  func.func @transform_3(%arg0: i32) -> (i32, i32, i32, i32) {
    %c0_i32 = arith.constant 0 : i32
    %c0_i32_0 = arith.constant 0 : i32
    %c0_i32_1 = arith.constant 0 : i32
    %c0_i32_2 = arith.constant 0 : i32
    return %arg0, %c0_i32, %c0_i32_0, %c0_i32_1 : i32, i32, i32, i32
  }
  func.func @transform_4(%arg0: i32) -> (i32, i32, i32, i32) {
    %c0_i32 = arith.constant 0 : i32
    %c0_i32_0 = arith.constant 0 : i32
    %c0_i32_1 = arith.constant 0 : i32
    %c0_i32_2 = arith.constant 0 : i32
    return %arg0, %c0_i32, %c0_i32_0, %c0_i32_1 : i32, i32, i32, i32
  }
  func.func @transform_5(%arg0: i32) -> (i32, i32, i32) {
    %c0_i32 = arith.constant 0 : i32
    %c0_i32_0 = arith.constant 0 : i32
    %c0_i32_1 = arith.constant 0 : i32
    return %arg0, %c0_i32, %c0_i32_0 : i32, i32, i32
  }
}

</mosaic_0001>

<bundles_post_ra>
// kernel: tpu_custom_call.1
= control target key start
LH: loop header
LB: loop body
LE: loop exit
PB: predicated region body
PF: predicated region fallthrough
CT: control target
= control target key end

     0   :  { %11 = vsyncpa [#allocation4], 0  ;;  %s2090_s0 = inlined_call_operand.vmem [shape: f32[2,4,9,9,4], index: 0, kind: input, shape index: {}]   ;;  %s2091_s1 = inlined_call_operand.vmem [shape: bf16[36,128], index: 1, kind: input, shape index: {}]   ;;  %s2092_s2 = inlined_call_operand.vmem [shape: bf16[4,128], index: 2, kind: input, shape index: {}]   ;;  %s2093_s3 = inlined_call_operand.hbm [shape: bf16[2,8,8,128], index: 3, kind: output, shape index: {0}]   ;;  %s2094_s4 = inlined_call_operand.hbm [shape: bf16[2,8,8,128], index: 4, kind: output, shape index: {1}]   ;;  %s2095_s5 = inlined_call_operand.hbm [shape: f32[2,8,128], index: 5, kind: output, shape index: {2}]  }
   0x1   :  { %13 = vsyncpa [#allocation4 + $0x1], 0 }
   0x2   :  { %14 = vsyncpa [#allocation6], 0 }
   0x3   :  { %16 = vsyncpa [#allocation6 + $0x1], 0  ;;  %s1630_s18 = smov 0   ;;  %s1632_s19 = smov 0  }
   0x4   :  { %s1634_s20 = smov 0   ;;  %s1636_s21 = smov 0  }
   0x5 LB: > { %s1651_s22 = sadd.s32 4294967295, %s1586_s21   ;;  %s2096_s23 = sadd.s32 4294967294, %s1586_s21   ;;  %s1586_s21 = sphi %s1636_s21, %s2103_s21   ;;  %s1582_s20 = sphi %s1634_s20, %s2102_s20   ;;  %s1578_s19 = sphi %s1632_s19, %s2101_s19   ;;  %s1574_s18 = sphi %s1630_s18, %s2100_s18  }
   0x6   : > { %s1655_s24 = sadd.s32 1, %s1586_s21   ;;  %s97_s25 = sadd.s32 1, %s1582_s20 }
   0x7   : > { %s94_s26 = ssub.s32 %s1586_s21, %s1655_s24  ;;  %p107_p0 = scmp.ne.s32.totalorder %s1582_s20, %s1578_s19 }
   0x8   : > { %p95_p1 = scmp.eq.s32.totalorder %s94_s26, 0  ;;  %p108_p2 = scmp.eq.s32.totalorder %s1651_s22, 1 }
   0x9   : > { %p113_p3 = scmp.ne.s32.totalorder %s1578_s19, %s1574_s18  ;;  %p114_p4 = scmp.eq.s32.totalorder %s2096_s23, 1 }
   0xa   : > { %s1668_s27 = scalar_select %p95_p1, %s1582_s20, %s97_s25  }
   0xb   : > { %p1670_p5 = por %p108_p2, %p107_p0  ;;  %p1674_p6 = por %p114_p4, %p113_p3 }
   0xc   : > { %p1194_p7 = scmp.ge.s32.totalorder %s1586_s21, 1  ;;  %p198_p8 = scmp.lt.s32.totalorder %s1586_s21, 3 }
   0xe   : > { %p199_p9 = pnand %p1194_p7, %p198_p8 }
   0xf   : > { %p236_p10 = scmp.lt.s32.totalorder (!%p199_p9), %s1651_s22, 1  ;;  %s1588_s10 = smov (!%p199_p9), 4   ;;  %vm250_vm0 = vcmask (!%p199_p9), 31744   ;;  %v1461_v28 = vld [vmem:[%s2091_s1] sm:$0xff] (!%p199_p9)   ;;  %v1462_v30 = vld [vmem:[%s2091_s1 + $0x8] sm:$0xff] (!%p199_p9)   ;;  %vm701_vm1 = vcmask (!%p199_p9), 1041408  }
  0x10   : > { %202 = sbr.rel (%p199_p9) target bundleno = 539 (0x21b), region = 32  ;;  %s1589_s11 = smov (!%p199_p9), 8   ;;  %1376 = vmatprep.subr.bf16.mxu0 (!%p199_p9), %v1461_v28  ;;  %v1463_v31 = vld [vmem:[%s2091_s1 + $0x10] ss:$0 sps:$4 sm:$0x33] (!%p199_p9)   ;;  %vm300_vm2 = vcmask (!%p199_p9), 64544  }
  0x11   : > { %s1590_s12 = smov (!%p199_p9), 12   ;;  %s1591_s13 = smov (!%p199_p9), 16   ;;  %1377 = vmatpush3.bf16.msra.mxu0 (!%p199_p9), %v1461_v28  ;;  %v703_v33 = vsel (!%p199_p9), %vm701_vm1, %v1463_v31, 0  ;;  %v858_v50 = vld [vmem:[%s2092_s2] sm:$0x3] (!%p199_p9)  ;;  %vm349_vm3 = vcmask (!%p199_p9), 97344  }
  0x12   : > { %s1592_s14 = smov (!%p199_p9), 20   ;;  %s1593_s15 = smov (!%p199_p9), 24   ;;  %1378 = vmatprep.subr.bf16.mxu0 (!%p199_p9), %v1462_v30  ;;  %v872_v51 = vsel (!%p199_p9), %vm701_vm1, %v858_v50, 0  ;;  %1401 = vmatprep.subr.msk.bf16.mxu1 (!%p199_p9), %vm701_vm1, %v858_v50  ;;  %vm399_vm4 = vcmask (!%p199_p9), 130144   ;;  %vm449_vm5 = vcmask (!%p199_p9), 162944   ;;  %vm498_vm6 = vcmask (!%p199_p9), 195744  }
  0x13   : > { %s1594_s25 = smov (!%p199_p9), 28   ;;  %s1595_s8 = smov (!%p199_p9), 32   ;;  %1391 = vmatpush3.bf16.msra.mxu1 (!%p199_p9), %v872_v51  ;;  %vm548_vm7 = vcmask (!%p199_p9), 228544   ;;  %vm598_vm8 = vcmask (!%p199_p9), 261344   ;;  %vm647_vm9 = vcmask (!%p199_p9), 294144   ;;  %vm688_vm10 = vcmask (!%p199_p9), 293888  }
  0x14   : > { %s1316_s26 = sshll.u32 (!%p199_p9), %s1651_s22, 9  ;;  %s1596_s16 = smov (!%p199_p9), [#allocation5]  }
  0x15   : > { %1379 = vmatpush3.bf16.msra.mxu0 (!%p199_p9), %v1462_v30  ;;  %s1977_s7 = scalar_lea.hbm (!%p199_p9), %s2094_s4, %s1316_s26 }
  0x16   : > { %1400 = vmatprep.subr.msk.bf16.mxu0 (!%p199_p9), %vm701_vm1, %v1463_v31 }
  0x17   : > { %s237_s30 = scalar_select %p236_p10, %s1651_s22, 1 }
  0x19   : > { %s1402_s6 = smul.u32 576, %s237_s30  ;;  %1381 = vmatpush3.bf16.msra.mxu0 %v703_v33 }
  0x1b   : > { %s1685_s9 = scalar_lea.vmem %s2090_s0, %s1402_s6 }
  0x1c   : > { %v1688_v0 = vld [vmem:[%s1685_s9 + $0xb0] sm:$0xff]  ;;  %v1695_v2 = vld [vmem:[%s1685_s9 + $0xc0] sm:$0xff] }
  0x1d   : > { %v1199_v1 = vld [vmem:[%s1685_s9 + $0x90] sm:$0xff]  ;;  %280 = vrot.lane.b32.xlu1 %v1688_v0, %s1588_s10  ;;  %v1698_v3 = vld [vmem:[%s1685_s9 + $0xa0] sm:$0xff] }
  0x1e   : > { %276 = vrot.lane.b32.xlu0 %v1199_v1, %s1588_s10  ;;  %v1705_v4 = vld [vmem:[%s1685_s9 + $0x11] sm:$0xff]  ;;  %v309_v5 = vld [vmem:[%s1685_s9 + $0x1] sm:$0xff] }
  0x1f   : > { %v1232_v6 = vld [vmem:[%s1685_s9 + $0x20] sm:$0xff]  ;;  %v1231_v7 = vld [vmem:[%s1685_s9 + $0x10] sm:$0xff] }
  0x20   : > { %v1234_v8 = vld [vmem:[%s1685_s9 + $0x40] sm:$0xff]  ;;  %v1233_v9 = vld [vmem:[%s1685_s9 + $0x30] sm:$0xff]  ;;  %253 = vst.msk [vmem:[#allocation2 + $0x10] sm:$0xff] %vm250_vm0, %v1232_v6  ;;  %252 = vst.msk [vmem:[#allocation2 + $0x8] sm:$0xff] %vm250_vm0, %v1231_v7 }
  0x21   : > { %282 = vrot.lane.b32.xlu1 %v1695_v2, %s1588_s10  ;;  %254 = vst.msk [vmem:[#allocation2 + $0x18] sm:$0xff] %vm250_vm0, %v1233_v9  ;;  %255 = vst.msk [vmem:[#allocation2 + $0x20] sm:$0xff] %vm250_vm0, %v1234_v8  ;;  %v1720_v10 = vld [vmem:[%s1685_s9 + $0x31] sm:$0xff]  ;;  %v311_v11 = vld [vmem:[%s1685_s9 + $0x21] sm:$0xff] }
  0x22   : > { %278 = vrot.lane.b32.xlu0 %v1698_v3, %s1588_s10  ;;  %v1208_v12 = vld [vmem:[%s1685_s9 + $0x130] sm:$0xff]  ;;  %v1207_v13 = vld [vmem:[%s1685_s9 + $0x120] sm:$0xff] }
  0x23   : > { %v1729_v14 = vld [vmem:[%s1685_s9 + $0x60] sm:$0xff]  ;;  %v1732_v15 = vld [vmem:[%s1685_s9 + $0x50] sm:$0xff] }
  0x24   : > { %v1737_v16 = vld [vmem:[%s1685_s9 + $0x70] sm:$0xff]  ;;  %v242_v17 = vld [vmem:[%s1685_s9] sm:$0xff]  ;;  %256 = vst.msk [vmem:[#allocation2 + $0x28] sm:$0xff] %vm250_vm0, %v1732_v15  ;;  %257 = vst.msk [vmem:[#allocation2 + $0x30] sm:$0xff] %vm250_vm0, %v1729_v14 }
  0x25   : > { %327 = vrot.lane.b32.xlu1 %v1705_v4, %s1589_s11  ;;  %v1210_v18 = vld [vmem:[%s1685_s9 + $0x150] sm:$0xff]  ;;  %v1209_v19 = vld [vmem:[%s1685_s9 + $0x140] sm:$0xff]  ;;  %251 = vst.msk [vmem:[#allocation2] sm:$0xff] %vm250_vm0, %v242_v17  ;;  %258 = vst.msk [vmem:[#allocation2 + $0x38] sm:$0xff] %vm250_vm0, %v1737_v16 }
  0x26   : > { %325 = vrot.lane.b32.xlu0 %v309_v5, %s1589_s11  ;;  %v1752_v20 = vld [vmem:[%s1685_s9 + $0x1c0] sm:$0xff]  ;;  %v1755_v21 = vld [vmem:[%s1685_s9 + $0x1b0] sm:$0xff] }
  0x27   : > { %v1762_v22 = vld [vmem:[%s1685_s9 + $0x1e0] sm:$0xff]  ;;  %v1765_v23 = vld [vmem:[%s1685_s9 + $0x1d0] sm:$0xff]  ;;  %v854_v54 = vpack.c.bf16 %v1752_v20, %v1755_v21 }
  0x28   : > { %v1224_v24 = vld [vmem:[%s1685_s9 + $0x131] sm:$0xff]  ;;  %v1223_v25 = vld [vmem:[%s1685_s9 + $0x121] sm:$0xff]  ;;  %v855_v55 = vpack.c.bf16 %v1762_v22, %v1765_v23 }
  0x29   : > { %331 = vrot.lane.b32.xlu1 %v1720_v10, %s1589_s11  ;;  %v1226_v26 = vld [vmem:[%s1685_s9 + $0x151] sm:$0xff]  ;;  %v1225_v27 = vld [vmem:[%s1685_s9 + $0x141] sm:$0xff]  ;;  %1392 = vmatprep.mubr.msk.bf16.mxu1 %vm250_vm0, %v854_v54 }
  0x2a   : > { %329 = vrot.lane.b32.xlu0 %v311_v11, %s1589_s11  ;;  %v1242_v29 = vld [vmem:[%s1685_s9 + $0xd0] sm:$0xff]  ;;  %v1204_v32 = vld [vmem:[%s1685_s9 + $0xe0] sm:$0xff]  ;;  %1393 = vmatmul.mubr.msk.bf16.vlgmr.msra.gmra.mrb[0].mxu1 %vm250_vm0, %v855_v55 }
  0x2b   : > { %v1250_v34 = vld [vmem:[%s1685_s9 + $0x41] sm:$0xff]  ;;  %v1205_v36 = vld [vmem:[%s1685_s9 + $0xf0] sm:$0xff] }
  0x2c   : > { %v1206_v35 = vld [vmem:[%s1685_s9 + $0x100] sm:$0xff]  ;;  %v314_v37 = vld [vmem:[%s1685_s9 + $0x51] sm:$0xff] }
  0x2d   : > { %377 = vrot.lane.b32.xlu1 %v1208_v12, %s1590_s12  ;;  %v1820_v38 = vld [vmem:[%s1685_s9 + $0x71] sm:$0xff]  ;;  %v315_v39 = vld [vmem:[%s1685_s9 + $0x61] sm:$0xff] }
  0x2e   : > { %375 = vrot.lane.b32.xlu0 %v1207_v13, %s1590_s12  ;;  %v1212_v40 = vld [vmem:[%s1685_s9 + $0x170] sm:$0xff]  ;;  %v1211_v41 = vld [vmem:[%s1685_s9 + $0x160] sm:$0xff] }
  0x2f   : > { %v1214_v42 = vld [vmem:[%s1685_s9 + $0x190] sm:$0xff]  ;;  %v1213_v43 = vld [vmem:[%s1685_s9 + $0x180] sm:$0xff] }
  0x30   : > { %v1220_v44 = vld [vmem:[%s1685_s9 + $0x200] sm:$0xff]  ;;  %v1219_v45 = vld [vmem:[%s1685_s9 + $0x1f0] sm:$0xff] }
  0x31   : > { %381 = vrot.lane.b32.xlu1 %v1210_v18, %s1590_s12  ;;  %v1222_v46 = vld [vmem:[%s1685_s9 + $0x220] sm:$0xff]  ;;  %v1221_v47 = vld [vmem:[%s1685_s9 + $0x210] sm:$0xff]  ;;  %v856_v57 = vpack.c.bf16 %v1220_v44, %v1219_v45 }
  0x32   : > { %379 = vrot.lane.b32.xlu0 %v1209_v19, %s1590_s12  ;;  %v1228_v48 = vld [vmem:[%s1685_s9 + $0x171] sm:$0xff]  ;;  %v1227_v49 = vld [vmem:[%s1685_s9 + $0x161] sm:$0xff]  ;;  %v857_v58 = vpack.c.bf16 %v1222_v46, %v1221_v47 }
  0x33   : > { %v1230_v52 = vld [vmem:[%s1685_s9 + $0x191] sm:$0xff]  ;;  %v1229_v53 = vld [vmem:[%s1685_s9 + $0x181] sm:$0xff]  ;;  %1396 = vmatprep.mubr.msk.bf16.mxu1 %vm250_vm0, %v856_v57 }
  0x34   : > { %v1238_v56 = vld [vmem:[%s1685_s9 + $0x80] sm:$0xff]  ;;  %1397 = vmatmul.mubr.msk.bf16.gmra.mrb[4].mxu1 %vm250_vm0, %v857_v58  ;;  %v1246_v59 = vld [vmem:[%s1685_s9 + $0x110] sm:$0xff] }
  0x35   : > { %427 = vrot.lane.b32.xlu1 %v1752_v20, %s1591_s13 }
  0x36   : > { %425 = vrot.lane.b32.xlu0 %v1755_v21, %s1591_s13 }
  0x39   : > { %431 = vrot.lane.b32.xlu1 %v1762_v22, %s1591_s13 }
  0x3a   : > { %429 = vrot.lane.b32.xlu0 %v1765_v23, %s1591_s13 }
  0x3d   : > { %476 = vrot.lane.b32.xlu1 %v1224_v24, %s1592_s14 }
  0x3e   : > { %474 = vrot.lane.b32.xlu0 %v1223_v25, %s1592_s14 }
  0x41   : > { %480 = vrot.lane.b32.xlu1 %v1226_v26, %s1592_s14 }
  0x42   : > { %478 = vrot.lane.b32.xlu0 %v1225_v27, %s1592_s14 }
  0x45   : > { %526 = vrot.lane.b32.xlu1 %v1232_v6, %s1593_s15 }
  0x46   : > { %524 = vrot.lane.b32.xlu0 %v1231_v7, %s1593_s15 }
  0x49   : > { %530 = vrot.lane.b32.xlu1 %v1234_v8, %s1593_s15 }
  0x4a   : > { %528 = vrot.lane.b32.xlu0 %v1233_v9, %s1593_s15 }
  0x4d   : > { %576 = vrot.lane.b32.xlu1 %v1688_v0, %s1594_s25  ;;  %v1254_v0 = vld [vmem:[%s1685_s9 + $0x81] sm:$0xff]  ;;  %s1951_s9 = sand.u32 1, %s1578_s19  }
  0x4e   : > { %574 = vrot.lane.b32.xlu0 %v1698_v3, %s1594_s25 }
  0x51   : > { %580 = vrot.lane.b32.xlu1 %v1242_v29, %s1594_s25 }
  0x52   : > { %578 = vrot.lane.b32.xlu0 %v1695_v2, %s1594_s25 }
  0x55   : > { %625 = vrot.lane.b32.xlu1 %v311_v11, %s1595_s8 }
  0x56   : > { %623 = vrot.lane.b32.xlu0 %v1705_v4, %s1595_s8 }
  0x59   : > { %286 = vrot.lane.b32.xlu1 %v1204_v32, %s1588_s10 }
  0x5a   : > { %284 = vrot.lane.b32.xlu0 %v1242_v29, %s1588_s10 }
  0x5d   : > { %629 = vrot.lane.b32.xlu1 %v1250_v34, %s1595_s8 }
  0x5e   : > { %627 = vrot.lane.b32.xlu0 %v1720_v10, %s1595_s8 }
  0x61   : > { %290 = vrot.lane.b32.xlu1 %v1206_v35, %s1588_s10 }
  0x62   : > { %288 = vrot.lane.b32.xlu0 %v1205_v36, %s1588_s10 }
  0x65   : > { %335 = vrot.lane.b32.xlu1 %v314_v37, %s1589_s11 }
  0x66   : > { %333 = vrot.lane.b32.xlu0 %v1250_v34, %s1589_s11 }
  0x69   : > { %339 = vrot.lane.b32.xlu1 %v1820_v38, %s1589_s11 }
  0x6a   : > { %337 = vrot.lane.b32.xlu0 %v315_v39, %s1589_s11 }
  0x6d   : > { %385 = vrot.lane.b32.xlu1 %v1212_v40, %s1590_s12 }
  0x6e   : > { %383 = vrot.lane.b32.xlu0 %v1211_v41, %s1590_s12 }
  0x71   : > { %389 = vrot.lane.b32.xlu1 %v1214_v42, %s1590_s12 }
  0x72   : > { %387 = vrot.lane.b32.xlu0 %v1213_v43, %s1590_s12  ;;  %s1195_s12 = sshll.u32 %s1951_s9, 5 }
  0x75   : > { %435 = vrot.lane.b32.xlu1 %v1220_v44, %s1591_s13 }
  0x76   : > { %433 = vrot.lane.b32.xlu0 %v1219_v45, %s1591_s13 }
  0x79   : > { %439 = vrot.lane.b32.xlu1 %v1222_v46, %s1591_s13 }
  0x7a   : > { %437 = vrot.lane.b32.xlu0 %v1221_v47, %s1591_s13  ;;  %s1956_s13 = scalar_lea.vmem [#allocation5], %s1195_s12 }
  0x7b   : > { %s1055_s17 = sshll.u32 %s1956_s13, 4  ;;  %s1968_s17 = int_to_ptr.vmem [resolvable:$true] %s1055_s17 }
  0x7c   : > { %s1464_s11 = scalar_lea.vmem %s1968_s17, 512 }
  0x7d   : > { %484 = vrot.lane.b32.xlu1 %v1228_v48, %s1592_s14  ;;  %p1465_p11 = scmp.ne.s32.totalorder %s1968_s17, %s1464_s11 }
  0x7e   : > { %482 = vrot.lane.b32.xlu0 %v1227_v49, %s1592_s14 }
  0x7f   : > { %p1466_p12 = pnand %p1465_p11, %p1670_p5 }
  0x81   : > { %488 = vrot.lane.b32.xlu1 %v1230_v52, %s1592_s14  ;;  %p1467_p13 = pneg %p1466_p12 }
  0x82   : > { %486 = vrot.lane.b32.xlu0 %v1229_v53, %s1592_s14  ;;  %s1197_s14 = sshll.u32 %s1951_s9, 3 }
  0x85   : > { %534 = vrot.lane.b32.xlu1 %v1729_v14, %s1593_s15 }
  0x86   : > { %532 = vrot.lane.b32.xlu0 %v1732_v15, %s1593_s15 }
  0x89   : > { %538 = vrot.lane.b32.xlu1 %v1238_v56, %s1593_s15 }
  0x8a   : > { %536 = vrot.lane.b32.xlu0 %v1737_v16, %s1593_s15  ;;  %s1963_s15 = scalar_lea.vmem [#allocation7], %s1197_s14 }
  0x8d   : > { %584 = vrot.lane.b32.xlu1 %v1205_v36, %s1594_s25 }
  0x8e   : > { %582 = vrot.lane.b32.xlu0 %v1204_v32, %s1594_s25 }
  0x8f   : > { %v281_v60 = vpop.permute.xlu1 %280 }
  0x90   : > { %v277_v61 = vpop.permute.xlu0 %276  ;;  %303 = vst.msk [vmem:[#allocation2 + $0x10] sm:$0xff] %vm300_vm2, %v281_v60 }
  0x91   : > { %301 = vst.msk [vmem:[#allocation2] sm:$0xff] %vm300_vm2, %v277_v61  ;;  %588 = vrot.lane.b32.xlu1 %v1246_v59, %s1594_s25 }
  0x92   : > { %586 = vrot.lane.b32.xlu0 %v1206_v35, %s1594_s25  ;;  %s1020_s25 = sand.u32 1, %s1651_s22  }
  0x93   : > { %v283_v62 = vpop.permute.xlu1 %282 }
  0x94   : > { %v279_v63 = vpop.permute.xlu0 %278  ;;  %304 = vst.msk [vmem:[#allocation2 + $0x18] sm:$0xff] %vm300_vm2, %v283_v62 }
  0x95   : > { %302 = vst.msk [vmem:[#allocation2 + $0x8] sm:$0xff] %vm300_vm2, %v279_v63  ;;  %633 = vrot.lane.b32.xlu1 %v315_v39, %s1595_s8 }
  0x96   : > { %631 = vrot.lane.b32.xlu0 %v314_v37, %s1595_s8 }
  0x97   : > { %v328_v1 = vpop.permute.xlu1 %327 }
  0x98   : > { %v326_v2 = vpop.permute.xlu0 %325  ;;  %351 = vst.msk [vmem:[#allocation2 + $0x8] sm:$0xff] %vm349_vm3, %v328_v1 }
  0x99   : > { %350 = vst.msk [vmem:[#allocation2] sm:$0xff] %vm349_vm3, %v326_v2  ;;  %637 = vrot.lane.b32.xlu1 %v1254_v0, %s1595_s8 }
  0x9a   : > { %635 = vrot.lane.b32.xlu0 %v1820_v38, %s1595_s8  ;;  %s1979_s8 = scalar_lea.sflag [#allocation6], %s1020_s25 }
  0x9b   : > { %v332_v3 = vpop.permute.xlu1 %331 }
  0x9c   : > { %v330_v4 = vpop.permute.xlu0 %329  ;;  %353 = vst.msk [vmem:[#allocation2 + $0x18] sm:$0xff] %vm349_vm3, %v332_v3 }
  0x9d   : > { %352 = vst.msk [vmem:[#allocation2 + $0x10] sm:$0xff] %vm349_vm3, %v330_v4 }
  0x9f   : > { %v378_v5 = vpop.permute.xlu1 %377 }
  0xa0   : > { %v376_v6 = vpop.permute.xlu0 %375  ;;  %401 = vst.msk [vmem:[#allocation2 + $0x8] sm:$0xff] %vm399_vm4, %v378_v5 }
  0xa1   : > { %400 = vst.msk [vmem:[#allocation2] sm:$0xff] %vm399_vm4, %v376_v6 }
  0xa3   : > { %v382_v7 = vpop.permute.xlu1 %381 }
  0xa4   : > { %v380_v8 = vpop.permute.xlu0 %379  ;;  %403 = vst.msk [vmem:[#allocation2 + $0x18] sm:$0xff] %vm399_vm4, %v382_v7 }
  0xa5   : > { %402 = vst.msk [vmem:[#allocation2 + $0x10] sm:$0xff] %vm399_vm4, %v380_v8 }
  0xa7   : > { %v428_v9 = vpop.permute.xlu1 %427 }
  0xa8   : > { %v426_v10 = vpop.permute.xlu0 %425  ;;  %451 = vst.msk [vmem:[#allocation2 + $0x8] sm:$0xff] %vm449_vm5, %v428_v9 }
  0xa9   : > { %450 = vst.msk [vmem:[#allocation2] sm:$0xff] %vm449_vm5, %v426_v10 }
  0xab   : > { %v432_v11 = vpop.permute.xlu1 %431 }
  0xac   : > { %v430_v12 = vpop.permute.xlu0 %429  ;;  %453 = vst.msk [vmem:[#allocation2 + $0x18] sm:$0xff] %vm449_vm5, %v432_v11 }
  0xad   : > { %452 = vst.msk [vmem:[#allocation2 + $0x10] sm:$0xff] %vm449_vm5, %v430_v12 }
  0xaf   : > { %v477_v13 = vpop.permute.xlu1 %476 }
  0xb0   : > { %v475_v14 = vpop.permute.xlu0 %474  ;;  %500 = vst.msk [vmem:[#allocation2 + $0x8] sm:$0xff] %vm498_vm6, %v477_v13 }
  0xb1   : > { %499 = vst.msk [vmem:[#allocation2] sm:$0xff] %vm498_vm6, %v475_v14 }
  0xb3   : > { %v481_v15 = vpop.permute.xlu1 %480 }
  0xb4   : > { %v479_v16 = vpop.permute.xlu0 %478  ;;  %502 = vst.msk [vmem:[#allocation2 + $0x18] sm:$0xff] %vm498_vm6, %v481_v15 }
  0xb5   : > { %501 = vst.msk [vmem:[#allocation2 + $0x10] sm:$0xff] %vm498_vm6, %v479_v16 }
  0xb7   : > { %v527_v17 = vpop.permute.xlu1 %526 }
  0xb8   : > { %v525_v18 = vpop.permute.xlu0 %524  ;;  %550 = vst.msk [vmem:[#allocation2 + $0x8] sm:$0xff] %vm548_vm7, %v527_v17 }
  0xb9   : > { %549 = vst.msk [vmem:[#allocation2] sm:$0xff] %vm548_vm7, %v525_v18 }
  0xbb   : > { %v531_v19 = vpop.permute.xlu1 %530 }
  0xbc   : > { %v529_v20 = vpop.permute.xlu0 %528  ;;  %552 = vst.msk [vmem:[#allocation2 + $0x18] sm:$0xff] %vm548_vm7, %v531_v19 }
  0xbd   : > { %551 = vst.msk [vmem:[#allocation2 + $0x10] sm:$0xff] %vm548_vm7, %v529_v20 }
  0xbf   : > { %v577_v21 = vpop.permute.xlu1 %576 }
  0xc0   : > { %v575_v22 = vpop.permute.xlu0 %574  ;;  %600 = vst.msk [vmem:[#allocation2 + $0x8] sm:$0xff] %vm598_vm8, %v577_v21 }
  0xc1   : > { %599 = vst.msk [vmem:[#allocation2] sm:$0xff] %vm598_vm8, %v575_v22 }
  0xc3   : > { %v581_v23 = vpop.permute.xlu1 %580 }
  0xc4   : > { %v579_v24 = vpop.permute.xlu0 %578  ;;  %602 = vst.msk [vmem:[#allocation2 + $0x18] sm:$0xff] %vm598_vm8, %v581_v23 }
  0xc5   : > { %601 = vst.msk [vmem:[#allocation2 + $0x10] sm:$0xff] %vm598_vm8, %v579_v24 }
  0xc7   : > { %v626_v25 = vpop.permute.xlu1 %625 }
  0xc8   : > { %v624_v26 = vpop.permute.xlu0 %623  ;;  %649 = vst.msk [vmem:[#allocation2 + $0x8] sm:$0xff] %vm647_vm9, %v626_v25 }
  0xc9   : > { %648 = vst.msk [vmem:[#allocation2] sm:$0xff] %vm647_vm9, %v624_v26 }
  0xcb   : > { %v287_v27 = vpop.permute.xlu1 %286 }
  0xcc   : > { %v285_v28 = vpop.permute.xlu0 %284  ;;  %306 = vst.msk [vmem:[#allocation2 + $0x28] sm:$0xff] %vm300_vm2, %v287_v27 }
  0xcd   : > { %305 = vst.msk [vmem:[#allocation2 + $0x20] sm:$0xff] %vm300_vm2, %v285_v28 }
  0xcf   : > { %v630_v29 = vpop.permute.xlu1 %629  ;;  %v657_v32 = vld [vmem:[#allocation2 + $0x8] sm:$0xff] }
  0xd0   : > { %v628_v30 = vpop.permute.xlu0 %627  ;;  %v656_v31 = vld [vmem:[#allocation2] sm:$0xff]  ;;  %651 = vst.msk [vmem:[#allocation2 + $0x18] sm:$0xff] %vm647_vm9, %v630_v29 }
  0xd1   : > { %650 = vst.msk [vmem:[#allocation2 + $0x10] sm:$0xff] %vm647_vm9, %v628_v30  ;;  %v664_v33 = vpack.c.bf16 %v657_v32, %v656_v31 }
  0xd3   : > { %1382 = vmatprep.mubr.msk.bf16.mxu0 %vm688_vm10, %v664_v33  ;;  %v291_v34 = vpop.permute.xlu1 %290 }
  0xd4   : > { %v289_v35 = vpop.permute.xlu0 %288  ;;  %308 = vst.msk [vmem:[#allocation2 + $0x38] sm:$0xff] %vm300_vm2, %v291_v34 }
  0xd5   : > { %307 = vst.msk [vmem:[#allocation2 + $0x30] sm:$0xff] %vm300_vm2, %v289_v35 }
  0xd7   : > { %v336_v36 = vpop.permute.xlu1 %335  ;;  %v659_v39 = vld [vmem:[#allocation2 + $0x18] sm:$0xff] }
  0xd8   : > { %v334_v37 = vpop.permute.xlu0 %333  ;;  %v658_v38 = vld [vmem:[#allocation2 + $0x10] sm:$0xff]  ;;  %355 = vst.msk [vmem:[#allocation2 + $0x28] sm:$0xff] %vm349_vm3, %v336_v36 }
  0xd9   : > { %354 = vst.msk [vmem:[#allocation2 + $0x20] sm:$0xff] %vm349_vm3, %v334_v37  ;;  %v665_v40 = vpack.c.bf16 %v659_v39, %v658_v38 }
  0xdb   : > { %1383 = vmatmul.mubr.msk.bf16.vlgmr.msra.gmra.mrb[0].mxu0 %vm688_vm10, %v665_v40  ;;  %v340_v41 = vpop.permute.xlu1 %339 }
  0xdc   : > { %v338_v42 = vpop.permute.xlu0 %337  ;;  %357 = vst.msk [vmem:[#allocation2 + $0x38] sm:$0xff] %vm349_vm3, %v340_v41 }
  0xdd   : > { %356 = vst.msk [vmem:[#allocation2 + $0x30] sm:$0xff] %vm349_vm3, %v338_v42 }
  0xdf   : > { %v386_v43 = vpop.permute.xlu1 %385 }
  0xe0   : > { %v384_v44 = vpop.permute.xlu0 %383  ;;  %405 = vst.msk [vmem:[#allocation2 + $0x28] sm:$0xff] %vm399_vm4, %v386_v43 }
  0xe1   : > { %404 = vst.msk [vmem:[#allocation2 + $0x20] sm:$0xff] %vm399_vm4, %v384_v44 }
  0xe3   : > { %v390_v45 = vpop.permute.xlu1 %389 }
  0xe4   : > { %v388_v46 = vpop.permute.xlu0 %387  ;;  %407 = vst.msk [vmem:[#allocation2 + $0x38] sm:$0xff] %vm399_vm4, %v390_v45 }
  0xe5   : > { %406 = vst.msk [vmem:[#allocation2 + $0x30] sm:$0xff] %vm399_vm4, %v388_v46 }
  0xe7   : > { %v436_v47 = vpop.permute.xlu1 %435 }
  0xe8   : > { %v434_v48 = vpop.permute.xlu0 %433  ;;  %455 = vst.msk [vmem:[#allocation2 + $0x28] sm:$0xff] %vm449_vm5, %v436_v47 }
  0xe9   : > { %454 = vst.msk [vmem:[#allocation2 + $0x20] sm:$0xff] %vm449_vm5, %v434_v48 }
  0xeb   : > { %v440_v49 = vpop.permute.xlu1 %439 }
  0xec   : > { %v438_v50 = vpop.permute.xlu0 %437  ;;  %457 = vst.msk [vmem:[#allocation2 + $0x38] sm:$0xff] %vm449_vm5, %v440_v49 }
  0xed   : > { %456 = vst.msk [vmem:[#allocation2 + $0x30] sm:$0xff] %vm449_vm5, %v438_v50 }
  0xef   : > { %v485_v51 = vpop.permute.xlu1 %484 }
  0xf0   : > { %v483_v52 = vpop.permute.xlu0 %482  ;;  %504 = vst.msk [vmem:[#allocation2 + $0x28] sm:$0xff] %vm498_vm6, %v485_v51 }
  0xf1   : > { %503 = vst.msk [vmem:[#allocation2 + $0x20] sm:$0xff] %vm498_vm6, %v483_v52 }
  0xf3   : > { %v489_v53 = vpop.permute.xlu1 %488 }
  0xf4   : > { %v487_v54 = vpop.permute.xlu0 %486  ;;  %506 = vst.msk [vmem:[#allocation2 + $0x38] sm:$0xff] %vm498_vm6, %v489_v53 }
  0xf5   : > { %505 = vst.msk [vmem:[#allocation2 + $0x30] sm:$0xff] %vm498_vm6, %v487_v54 }
  0xf7   : > { %v535_v55 = vpop.permute.xlu1 %534 }
  0xf8   : > { %v533_v56 = vpop.permute.xlu0 %532  ;;  %554 = vst.msk [vmem:[#allocation2 + $0x28] sm:$0xff] %vm548_vm7, %v535_v55 }
  0xf9   : > { %553 = vst.msk [vmem:[#allocation2 + $0x20] sm:$0xff] %vm548_vm7, %v533_v56 }
  0xfb   : > { %v539_v57 = vpop.permute.xlu1 %538 }
  0xfc   : > { %v537_v58 = vpop.permute.xlu0 %536  ;;  %556 = vst.msk [vmem:[#allocation2 + $0x38] sm:$0xff] %vm548_vm7, %v539_v57 }
  0xfd   : > { %555 = vst.msk [vmem:[#allocation2 + $0x30] sm:$0xff] %vm548_vm7, %v537_v58  ;;  %v1394_v9 = vpop.f32.mrb[0].mxu1 }
  0xfe   : > { %v908_v10 = vpop.f32.mrb[1].mxu1  ;;  %v995_v15 = vmul.f32 %v1394_v9, %v1394_v9 }
  0xff   : > { %v585_v59 = vpop.permute.xlu1 %584  ;;  %v993_v11 = vmul.f32 %v908_v10, %v908_v10  ;;  %v1395_v12 = vpop.f32.mrb[2].mxu1 }
 0x100   : > { %v583_v60 = vpop.permute.xlu0 %582  ;;  %604 = vst.msk [vmem:[#allocation2 + $0x28] sm:$0xff] %vm598_vm8, %v585_v59  ;;  %v1346_v13 = vpack.c.bf16 %v1395_v12, %v1394_v9  ;;  %v911_v14 = vpop.f32.mrb[3].mxu1  ;;  %v996_v19 = vmul.f32 %v1395_v12, %v1395_v12 }
 0x101   : > { %603 = vst.msk [vmem:[#allocation2 + $0x20] sm:$0xff] %vm598_vm8, %v583_v60  ;;  %v1341_v16 = vpack.c.bf16 %v911_v14, %v908_v10  ;;  %v979_v17 = vadd.f32 %v911_v14, %v908_v10  ;;  %v994_v18 = vmul.f32 %v911_v14, %v911_v14 }
 0x102   : > { %1361 = vst [vmem:[%s1956_s13 + $0x8] sm:$0xff] %v1346_v13  }
 0x103   : > { %v589_v61 = vpop.permute.xlu1 %588  ;;  %1342 = vst [vmem:[%s1956_s13] sm:$0xff] %v1341_v16   ;;  %v980_v20 = vadd.f32 %v1394_v9, %v979_v17  ;;  %v1001_v21 = vadd.f32 %v994_v18, %v993_v11 }
 0x104   : > { %v587_v62 = vpop.permute.xlu0 %586  ;;  %606 = vst.msk [vmem:[#allocation2 + $0x38] sm:$0xff] %vm598_vm8, %v589_v61 }
 0x105   : > { %605 = vst.msk [vmem:[#allocation2 + $0x30] sm:$0xff] %vm598_vm8, %v587_v62  ;;  %v1002_v22 = vadd.f32 %v1001_v21, %v995_v15  ;;  %v981_v24 = vadd.f32 %v1395_v12, %v980_v20 }
 0x107   : > { %v634_v63 = vpop.permute.xlu1 %633  ;;  %v1398_v23 = vpop.f32.mrb[4].mxu1  ;;  %v1003_v28 = vadd.f32 %v1002_v22, %v996_v19 }
 0x108   : > { %v632_v0 = vpop.permute.xlu0 %631  ;;  %653 = vst.msk [vmem:[#allocation2 + $0x28] sm:$0xff] %vm647_vm9, %v634_v63  ;;  %v924_v25 = vpop.f32.mrb[5].mxu1  ;;  %v999_v30 = vmul.f32 %v1398_v23, %v1398_v23 }
 0x109   : > { %652 = vst.msk [vmem:[#allocation2 + $0x20] sm:$0xff] %vm647_vm9, %v632_v0  ;;  %v982_v26 = vadd.f32 %v981_v24, %v924_v25  ;;  %v997_v27 = vmul.f32 %v924_v25, %v924_v25  ;;  %v1399_v29 = vpop.f32.mrb[6].mxu1 }
 0x10a   : > { %v1356_v31 = vpack.c.bf16 %v1399_v29, %v1398_v23  ;;  %v927_v32 = vpop.f32.mrb[7].mxu1  ;;  %v1000_v37 = vmul.f32 %v1399_v29, %v1399_v29 }
 0x10b   : > { %v638_v1 = vpop.permute.xlu1 %637  ;;  %v1004_v33 = vadd.f32 %v1003_v28, %v997_v27  ;;  %v1351_v34 = vpack.c.bf16 %v927_v32, %v924_v25  ;;  %v983_v35 = vadd.f32 %v982_v26, %v927_v32  ;;  %v998_v36 = vmul.f32 %v927_v32, %v927_v32 }
 0x10c   : > { %v636_v2 = vpop.permute.xlu0 %635  ;;  %655 = vst.msk [vmem:[#allocation2 + $0x38] sm:$0xff] %vm647_vm9, %v638_v1  ;;  %1363 = vst [vmem:[%s1956_s13 + $0x18] sm:$0xff] %v1356_v31  }
 0x10d   : > { %654 = vst.msk [vmem:[#allocation2 + $0x30] sm:$0xff] %vm647_vm9, %v636_v2  ;;  %1362 = vst [vmem:[%s1956_s13 + $0x10] sm:$0xff] %v1351_v34   ;;  %v984_v38 = vadd.f32 %v1398_v23, %v983_v35  ;;  %v1005_v39 = vadd.f32 %v1004_v33, %v998_v36  ;;  %s1468_s13 = sshll.u32 %s1596_s16, 4  ;;  %s1469_s13 = int_to_ptr.vmem [resolvable:$false] %s1468_s13 }
 0x10e   : > { %s1470_s14 = scalar_lea.vmem %s1469_s13, 1024  ;;  %p1471_p0 = scmp.lt.s32.totalorder %s1968_s17, %s1469_s13 }
 0x10f   : > { %v661_v4 = vld [vmem:[#allocation2 + $0x28] sm:$0xff]  ;;  %v985_v40 = vadd.f32 %v1399_v29, %v984_v38  ;;  %v1006_v41 = vadd.f32 %v1005_v39, %v999_v30  ;;  %p1472_p1 = scmp.lt.s32.totalorder %s1470_s14, %s1464_s11 }
 0x110   : > { %v660_v3 = vld [vmem:[#allocation2 + $0x20] sm:$0xff] }
 0x111   : > { %v666_v5 = vpack.c.bf16 %v661_v4, %v660_v3  ;;  %v986_v42 = vrot.slane %v985_v40, 4  ;;  %v1007_v43 = vadd.f32 %v1006_v41, %v1000_v37  ;;  %p1473_p2 = por %p1472_p1, %p1471_p0 }
 0x113   : > { %1386 = vmatprep.mubr.msk.bf16.mxu0 %vm688_vm10, %v666_v5  ;;  %v663_v7 = vld [vmem:[#allocation2 + $0x38] sm:$0xff]  ;;  %v987_v44 = vadd.f32 %v986_v42, %v985_v40  ;;  %v1008_v45 = vrot.slane %v1007_v43, 4  ;;  %p1474_p3 = pnand %p1473_p2, %p1467_p13 }
 0x114   : > { %v662_v6 = vld [vmem:[#allocation2 + $0x30] sm:$0xff] }
 0x115   : > { %v667_v8 = vpack.c.bf16 %v663_v7, %v662_v6  ;;  %v988_v46 = vrot.slane %v987_v44, 2  ;;  %v1009_v47 = vadd.f32 %v1008_v45, %v1007_v43 }
 0x117   : > { %1387 = vmatmul.mubr.msk.bf16.gmra.mrb[4].mxu0 %vm688_vm10, %v667_v8  ;;  %v989_v48 = vadd.f32 %v988_v46, %v987_v44  ;;  %v1010_v49 = vrot.slane %v1009_v47, 2 }
 0x119   : > { %v990_v50 = vrot.slane %v989_v48, 1  ;;  %v1011_v51 = vadd.f32 %v1010_v49, %v1009_v47 }
 0x11b   : > { %v991_v52 = vadd.f32 %v990_v50, %v989_v48  ;;  %v1012_v53 = vrot.slane %v1011_v51, 1 }
 0x11d   : > { %992 = vst [vmem:[%s1963_s15 + $0x2] sm:$0x1] %v991_v52  ;;  %v1013_v54 = vadd.f32 %v1012_v53, %v1011_v51 }
 0x11f   : > { %1014 = vst [vmem:[%s1963_s15 + $0x3] sm:$0x1] %v1013_v54 }
 0x120   : > { %1477 = shalt.err (!%p1474_p3)
}
 0x121   : > { %s1478_s25 = scalar_lea.hbm %s1977_s7, 512  ;;  %s1482_s16 = scalar_lea.hbm %s2094_s4, 1024 }
 0x122   : > { %p1479_p4 = scmp.ne.s32.totalorder %s1977_s7, %s1478_s25  ;;  %p1483_p9 = scmp.lt.u32.totalorder %s1977_s7, %s2094_s4 }
 0x123   : > { %p1484_p10 = scmp.lt.u32.totalorder %s1482_s16, %s1478_s25  ;;  %p1486_p12 = scmp.lt.u32.totalorder %s1478_s25, %s1977_s7 }
 0x124   : > { %p1480_p7 = pnand %p1479_p4, %p1670_p5 }
 0x125   : > { %p1485_p11 = por %p1484_p10, %p1483_p9 }
 0x126   : > { %p1481_p8 = pneg %p1480_p7 }
 0x127   : > { %p1487_p13 = por %p1486_p12, %p1485_p11 }
 0x129   : > { %p1488_p0 = pnand %p1487_p13, %p1481_p8 }
 0x12b   : > { %1491 = shalt.err (!%p1488_p0)
}
 0x12c   : > { %s1597_s11 = smov 64   ;;  %s221_s23 = scalar_lea.vmem [#allocation3], %s1195_s12 }
 0x12d   : > { %1404 = dma.vmem_to_hbm [thread:$0]  (%p1670_p5), %s1968_s17, 512, %s1977_s7, %s1979_s8, %s1597_s11, %s1597_s11, %s1588_s10  }
 0x12e   : > { %s1039_s17 = sshll.u32 %s221_s23, 4  ;;  %s2015_s14 = scalar_lea.hbm %s2093_s3, %s1316_s26  ;;  %s2008_s17 = int_to_ptr.vmem [resolvable:$true] %s1039_s17 }
 0x12f   : > { %s1016_s25 = scalar_lea.sflag [#allocation4], %s1951_s9  ;;  %s1492_s30 = scalar_lea.vmem %s2008_s17, 512 }
 0x130   : > { %p1493_p1 = scmp.ne.s32.totalorder %s2008_s17, %s1492_s30  ;;  %s1598_s6 = smov [#allocation3]  }
 0x131   : > { %s1496_s16 = sshll.u32 %s1598_s6, 4  ;;  %s1497_s16 = int_to_ptr.vmem [resolvable:$false] %s1496_s16 }
 0x132   : > { %p1494_p2 = pnand %p1493_p1, %p1670_p5  ;;  %s1498_s13 = scalar_lea.vmem %s1497_s16, 1024 }
 0x133   : > { %p1499_p4 = scmp.lt.s32.totalorder %s2008_s17, %s1497_s16  ;;  %p1500_p7 = scmp.lt.s32.totalorder %s1498_s13, %s1492_s30 }
 0x134   : > { %p1495_p3 = pneg %p1494_p2 }
 0x135   : > { %p1501_p8 = por %p1500_p7, %p1499_p4 }
 0x137   : > { %p1502_p9 = pnand %p1501_p8, %p1495_p3 }
 0x1ae   : > { %v1384_v55 = vpop.f32.mrb[0].mxu0 }
 0x1af   : > { %v739_v56 = vpop.f32.mrb[1].mxu0  ;;  %v826_v0 = vmul.f32 %v1384_v55, %v1384_v55 }
 0x1b0   : > { %v1385_v57 = vpop.f32.mrb[2].mxu0  ;;  %v824_v60 = vmul.f32 %v739_v56, %v739_v56 }
 0x1b1   : > { %v1326_v58 = vpack.c.bf16 %v1385_v57, %v1384_v55  ;;  %v742_v59 = vpop.f32.mrb[3].mxu0  ;;  %v827_v3 = vmul.f32 %v1385_v57, %v1385_v57 }
 0x1b2   : > { %v1321_v61 = vpack.c.bf16 %v742_v59, %v739_v56  ;;  %v810_v62 = vadd.f32 %v742_v59, %v739_v56  ;;  %v825_v63 = vmul.f32 %v742_v59, %v742_v59 }
 0x1b3   : > { %1358 = vst [vmem:[%s221_s23 + $0x8] sm:$0xff] %v1326_v58  }
 0x1b4   : > { %1322 = vst [vmem:[%s221_s23] sm:$0xff] %v1321_v61   ;;  %v811_v1 = vadd.f32 %v1384_v55, %v810_v62  ;;  %v832_v2 = vadd.f32 %v825_v63, %v824_v60 }
 0x1b6   : > { %v833_v4 = vadd.f32 %v832_v2, %v826_v0  ;;  %v812_v5 = vadd.f32 %v1385_v57, %v811_v1 }
 0x1b8   : > { %v834_v6 = vadd.f32 %v833_v4, %v827_v3 }
 0x1ea   : > { %v1388_v7 = vpop.f32.mrb[4].mxu0 }
 0x1eb   : > { %v755_v8 = vpop.f32.mrb[5].mxu0  ;;  %v830_v18 = vmul.f32 %v1388_v7, %v1388_v7 }
 0x1ec   : > { %v813_v9 = vadd.f32 %v812_v5, %v755_v8  ;;  %v828_v10 = vmul.f32 %v755_v8, %v755_v8  ;;  %v1389_v11 = vpop.f32.mrb[6].mxu0 }
 0x1ed   : > { %v1336_v12 = vpack.c.bf16 %v1389_v11, %v1388_v7  ;;  %v758_v13 = vpop.f32.mrb[7].mxu0 }
 0x1ee   : > { %v835_v14 = vadd.f32 %v834_v6, %v828_v10  ;;  %v1331_v15 = vpack.c.bf16 %v758_v13, %v755_v8  ;;  %v814_v16 = vadd.f32 %v813_v9, %v758_v13  ;;  %v829_v17 = vmul.f32 %v758_v13, %v758_v13 }
 0x1ef   : > { %1360 = vst [vmem:[%s221_s23 + $0x18] sm:$0xff] %v1336_v12  }
 0x1f0   : > { %1359 = vst [vmem:[%s221_s23 + $0x10] sm:$0xff] %v1331_v15   ;;  %v815_v19 = vadd.f32 %v1388_v7, %v814_v16  ;;  %v836_v20 = vadd.f32 %v835_v14, %v829_v17 }
 0x1f1   : > { %1505 = shalt.err (!%p1502_p9)
}
 0x1f2   : > { %s1506_s26 = scalar_lea.hbm %s2015_s14, 512  ;;  %s1510_s7 = scalar_lea.hbm %s2093_s3, 1024 }
 0x1f3   : > { %p1507_p10 = scmp.ne.s32.totalorder %s2015_s14, %s1506_s26  ;;  %p1511_p13 = scmp.lt.u32.totalorder %s2015_s14, %s2093_s3 }
 0x1f4   : > { %p1512_p0 = scmp.lt.u32.totalorder %s1510_s7, %s1506_s26  ;;  %p1514_p2 = scmp.lt.u32.totalorder %s1506_s26, %s2015_s14 }
 0x1f5   : > { %p1508_p11 = pnand %p1507_p10, %p1670_p5 }
 0x1f6   : > { %p1513_p1 = por %p1512_p0, %p1511_p13 }
 0x1f7   : > { %p1509_p12 = pneg %p1508_p11 }
 0x1f8   : > { %p1515_p3 = por %p1514_p2, %p1513_p1 }
 0x1fa   : > { %p1516_p4 = pnand %p1515_p3, %p1509_p12 }
 0x1fc   : > { %1519 = shalt.err (!%p1516_p4)
}
 0x1fd   : > { %1403 = dma.vmem_to_hbm [thread:$0]  (%p1670_p5), %s2008_s17, 512, %s2015_s14, %s1016_s25, %s1597_s11, %s1597_s11, %s1588_s10   ;;  %v831_v21 = vmul.f32 %v1389_v11, %v1389_v11  ;;  %v816_v22 = vadd.f32 %v1389_v11, %v815_v19  ;;  %v837_v23 = vadd.f32 %v836_v20, %v830_v18 }
 0x1fe   : > { %s1297_s9 = sshll.u32 %s1651_s22, 7  ;;  %s1071_s30 = sshll.u32 %s1963_s15, 4  ;;  %s1072_s30 = int_to_ptr.vmem [resolvable:$true] %s1071_s30 }
 0x1ff   : > { %v817_v24 = vrot.slane %v816_v22, 4  ;;  %v838_v25 = vadd.f32 %v837_v23, %v831_v21  ;;  %s2050_s17 = scalar_lea.hbm %s2095_s5, %s1297_s9  ;;  %s1520_s14 = scalar_lea.vmem %s1072_s30, 128 }
 0x200   : > { %p1521_p7 = scmp.ne.s32.totalorder %s1072_s30, %s1520_s14  ;;  %s1599_s25 = smov [#allocation7]  }
 0x201   : > { %v818_v26 = vadd.f32 %v817_v24, %v816_v22  ;;  %v839_v27 = vrot.slane %v838_v25, 4  ;;  %s1524_s13 = sshll.u32 %s1599_s25, 4  ;;  %s1525_s13 = int_to_ptr.vmem [resolvable:$false] %s1524_s13 }
 0x202   : > { %p1522_p8 = pnand %p1521_p7, %p1670_p5  ;;  %s1526_s22 = scalar_lea.vmem %s1525_s13, 256 }
 0x203   : > { %v819_v28 = vrot.slane %v818_v26, 2  ;;  %v840_v29 = vadd.f32 %v839_v27, %v838_v25  ;;  %p1527_p10 = scmp.lt.s32.totalorder %s1072_s30, %s1525_s13  ;;  %p1528_p11 = scmp.lt.s32.totalorder %s1526_s22, %s1520_s14 }
 0x204   : > { %p1523_p9 = pneg %p1522_p8 }
 0x205   : > { %v820_v30 = vadd.f32 %v819_v28, %v818_v26  ;;  %v841_v31 = vrot.slane %v840_v29, 2  ;;  %p1529_p12 = por %p1528_p11, %p1527_p10 }
 0x207   : > { %v821_v32 = vrot.slane %v820_v30, 1  ;;  %v842_v33 = vadd.f32 %v841_v31, %v840_v29  ;;  %p1530_p13 = pnand %p1529_p12, %p1523_p9 }
 0x209   : > { %v822_v34 = vadd.f32 %v821_v32, %v820_v30  ;;  %v843_v35 = vrot.slane %v842_v33, 1 }
 0x20b   : > { %823 = vst [vmem:[%s1963_s15] sm:$0x1] %v822_v34  ;;  %v844_v36 = vadd.f32 %v843_v35, %v842_v33 }
 0x20d   : > { %845 = vst [vmem:[%s1963_s15 + $0x1] sm:$0x1] %v844_v36 }
 0x20e   : > { %1533 = shalt.err (!%p1530_p13)
}
 0x20f   : > { %s1534_s15 = scalar_lea.hbm %s2050_s17, 128  ;;  %s1538_s12 = scalar_lea.hbm %s2095_s5, 256 }
 0x210   : > { %p1535_p0 = scmp.ne.s32.totalorder %s2050_s17, %s1534_s15  ;;  %p1539_p3 = scmp.lt.u32.totalorder %s2050_s17, %s2095_s5 }
 0x211   : > { %p1540_p4 = scmp.lt.u32.totalorder %s1538_s12, %s1534_s15  ;;  %p1542_p8 = scmp.lt.u32.totalorder %s1534_s15, %s2050_s17 }
 0x212   : > { %p1536_p1 = pnand %p1535_p0, %p1670_p5 }
 0x213   : > { %p1541_p7 = por %p1540_p4, %p1539_p3 }
 0x214   : > { %p1537_p2 = pneg %p1536_p1 }
 0x215   : > { %p1543_p9 = por %p1542_p8, %p1541_p7 }
 0x217   : > { %p1544_p10 = pnand %p1543_p9, %p1537_p2 }
 0x219   : > { %1547 = shalt.err (!%p1544_p10)
}
 0x21a   : > { %1405 = dma.vmem_to_hbm [thread:$0]  (%p1670_p5), %s1072_s30, 128, %s2050_s17, %s1979_s8  }
 0x21b PF: > { %p1419_p11 = scmp.ge.s32.totalorder %s1586_s21, 2  ;;  %s1083_s16 = sand.u32 1, %s1574_s18  }
 0x21c   : > { %s1084_s9 = scalar_lea.sflag [#allocation4], %s1083_s16 }
 0x21d   : > { %p1410_p12 = pnand %p1419_p11, %p1674_p6 }
 0x21f   : > { %1565 = dma.done.wait (!%p1410_p12), %s1084_s9, 512  }
 0x220   : > { %1567 = vsyncadd (!%p1410_p12), %s1084_s9, 4294966784  ;;  %s2099_s10 = sadd.s32 4294967294, %s1586_s21  }
 0x221   : > { %s1092_s11 = sand.u32 1, %s2099_s10  }
 0x222   : > { %s1093_s14 = scalar_lea.sflag [#allocation6], %s1092_s11 }
 0x223   : > { %1569 = dma.done.wait (!%p1410_p12), %s1093_s14, 640  }
 0x224   : > { %1571 = vsyncadd (!%p1410_p12), %s1093_s14, 4294966656  ;;  %p19_p5 = scmp.ge.s32.totalorder %s1655_s24, 4   ;;  %s2100_s18 = smov %s1578_s19 }
 0x225   : > { %s2101_s19 = smov %s1582_s20  ;;  %s2102_s20 = smov %s1668_s27 }
 0x226   : > { %s2103_s21 = smov %s1655_s24  ;;  %21 = sbr.rel (!%p19_p5) target bundleno = 5 (0x5), region = 104 }
 0x22d   :  { %1107 = vsyncpa [#allocation4], 1 }
 0x22e   :  { %1109 = vsyncpa [#allocation4 + $0x1], 1 }
 0x22f   :  { %1110 = vsyncpa [#allocation6], 1 }
 0x230   :  { %1112 = vsyncpa [#allocation6 + $0x1], 1 }

</bundles_post_ra>
